<compile_context>
chip_gen: v7x
topology: tpu7x:2x2x1
jax: 0.10.0
libtpu: 0.0.40
codegen_flags: <defaults>
</compile_context>

<pallas_src>
import functools

import jax
import jax.numpy as jnp
from jax.experimental import pallas as pl
from jax.experimental.pallas import tpu as pltpu

_LANE = 128      # lane width (last dim)
_SUBLANE_F32 = 8
_SUBLANE_BF16 = 16


def _round_up(x, m):
    return (x + m - 1) // m * m


def _mlps_fused_kernel(b_real_ref, x_ref, *refs, n_layers, active_last,
                       compute_hid, hid_pad, use_bf16):
    """Whole MLP stack in one grid-less kernel.

    b_real_ref : SMEM (1,) int32           -- true (unpadded) batch size
    x_ref      : VMEM (B_pad, in_pad0) f32 -- zero-padded input
    refs       : w_0..w_{L-1}  VMEM (in_pad_i, out_pad_i)  (pre-transposed)
                 b_0..b_{L-1}  VMEM (1, out_pad_i) f32
                 out_ref       VMEM (B_pad, out_pad_last) f32
                 [hid_ref]     VMEM (n_layers, hid_pad) f32  (if compute_hid)
    """
    w_refs = refs[:n_layers]
    b_refs = refs[n_layers:2 * n_layers]
    out_ref = refs[2 * n_layers]
    hid_ref = refs[2 * n_layers + 1] if compute_hid else None

    act = x_ref[...]                                       # (B_pad, in_pad0) f32

    if compute_hid:
        b_real = b_real_ref[0]
        inv_b = 1.0 / b_real.astype(jnp.float32)
        row_ids = jax.lax.broadcasted_iota(jnp.int32, (act.shape[0], 1), 0)
        # One precomputed scale: real rows get 1/B, batch-padding rows get 0.
        scaled_mask = jnp.where(row_ids < b_real, inv_b, 0.0)   # (B_pad, 1)

    for i in range(n_layers):                              # static unroll
        w = w_refs[i][...]                                 # (in_pad_i, out_pad_i)
        lhs = act.astype(jnp.bfloat16) if use_bf16 else act
        # z = x @ W + b   (W pre-transposed to (in, out); MXU, f32 accumulate)
        z = jnp.dot(lhs, w, preferred_element_type=jnp.float32) + b_refs[i][...]

        if (i != n_layers - 1) or active_last:
            act = jnp.maximum(z, 0.0)                      # fwd_act = ReLU
        else:
            act = z

        if compute_hid:
            sig = jax.nn.sigmoid(z)                        # hid_act = Sigmoid (EUP)
            hid_row = jnp.sum(sig * scaled_mask, axis=0, keepdims=True)
            pad_w = hid_pad - hid_row.shape[1]
            if pad_w:                                      # static; lane-pad to hid_pad
                hid_row = jnp.concatenate(
                    [hid_row, jnp.zeros((1, pad_w), jnp.float32)], axis=1)
            hid_ref[i:i + 1, :] = hid_row

    out_ref[...] = act


@functools.partial(
    jax.jit,
    static_argnames=("layer_list", "active_last", "compute_hid", "use_bf16"))
def _mlps_forward(x, ws, bs, *, layer_list, active_last, compute_hid, use_bf16):
    """Single-dispatch forward: pad -> fused pallas kernel -> unpad/slice."""
    n_layers = len(layer_list) - 1
    B, in_d = x.shape
    sublane = _SUBLANE_BF16 if use_bf16 else _SUBLANE_F32
    b_pad = _round_up(max(B, sublane), sublane)
    in_pad0 = _round_up(in_d, _LANE)
    out_pads = tuple(_round_up(d, _LANE) for d in layer_list[1:])
    hid_pad = max(out_pads)

    # Pad input (fused by XLA into the same dispatch as the kernel launch).
    x_pad = jnp.zeros((b_pad, in_pad0), jnp.float32)
    x_pad = x_pad.at[:B, :in_d].set(x.astype(jnp.float32))
    # True batch size as kernel DATA (SMEM scalar) -> Mosaic kernel is shared
    # across all batch sizes with the same padded shape.
    b_real_arr = jnp.full((1,), B, jnp.int32)

    smem = pl.BlockSpec(memory_space=pltpu.MemorySpace.SMEM)
    vmem = pl.BlockSpec(memory_space=pltpu.MemorySpace.VMEM)

    out_shapes = [jax.ShapeDtypeStruct((b_pad, out_pads[-1]), jnp.float32)]
    out_specs = [vmem]
    if compute_hid:
        out_shapes.append(jax.ShapeDtypeStruct((n_layers, hid_pad), jnp.float32))
        out_specs.append(vmem)

    # Everything is VMEM-resident (no grid). Only raise the scoped VMEM limit
    # if the resident footprint would exceed the 32 MiB default (v7x has just
    # 64 MiB physical); at toy sizes this stays None.
    w_itemsize = 2 if use_bf16 else 4
    out_elems = b_pad * out_pads[-1] + (n_layers * hid_pad if compute_hid else 0)
    vmem_bytes = (4 * (x_pad.size + out_elems + sum(b.size for b in bs))
                  + w_itemsize * sum(w.size for w in ws))
    compiler_params = None
    if vmem_bytes > 24 * 1024 * 1024:
        compiler_params = pltpu.CompilerParams(
            vmem_limit_bytes=min(2 * vmem_bytes, 100 * 1024 * 1024))

    kernel = functools.partial(
        _mlps_fused_kernel,
        n_layers=n_layers, active_last=active_last,
        compute_hid=compute_hid, hid_pad=hid_pad, use_bf16=use_bf16)

    outs = pl.pallas_call(
        kernel,
        out_shape=tuple(out_shapes),
        in_specs=[smem, vmem] + [vmem] * (2 * n_layers),
        out_specs=tuple(out_specs),
        compiler_params=compiler_params,
    )(b_real_arr, x_pad, *ws, *bs)

    hids = []
    if compute_hid:
        y_pad, hid_out = outs
        for i, out_d in enumerate(layer_list[1:]):
            h = hid_out[i, :out_d]            # sigmoid(z_i).mean over real batch
            hids.append(h.reshape(-1, 1))     # hid.view(-1, 1)
            hids.append(h)                    # hid
    else:
        (y_pad,) = outs
    out_x = y_pad[:B, :layer_list[-1]]
    return hids, out_x


class MLPSPallas:
    """JAX/Pallas port of cbpy.net.MLPS (fwd_act = ReLU, hid_act = Sigmoid)."""

    def __init__(self, layer_list, key, active_last=False, use_bf16_matmul=False):
        self.layer_list = tuple(int(d) for d in layer_list)
        self.active_last = bool(active_last)
        self.use_bf16 = bool(use_bf16_matmul)
        self.n_layer = len(self.layer_list) - 1

        w_dtype = jnp.bfloat16 if self.use_bf16 else jnp.float32
        self.params = []          # original layout (w: (out,in), b: (1,out)), f32
        ws, bs = [], []
        # Deterministic init mimicking PyTorch's default Linear init:
        # U(-1/sqrt(in_d), 1/sqrt(in_d)) for both weight and bias.
        for in_d, out_d in zip(self.layer_list[:-1], self.layer_list[1:]):
            key, kw, kb = jax.random.split(key, 3)
            bound = 1.0 / float(in_d) ** 0.5
            w = jax.random.uniform(kw, (out_d, in_d), jnp.float32, -bound, bound)
            b = jax.random.uniform(kb, (1, out_d), jnp.float32, -bound, bound)
            self.params.append((w, b))
            # Kernel layout: pre-transposed (in, out), per-layer lane padding.
            in_pad = _round_up(in_d, _LANE)
            out_pad = _round_up(out_d, _LANE)
            w_p = jnp.zeros((in_pad, out_pad), jnp.float32)
            w_p = w_p.at[:in_d, :out_d].set(w.T).astype(w_dtype)
            b_p = jnp.zeros((1, out_pad), jnp.float32)
            b_p = b_p.at[:, :out_d].set(b)      # bias / elementwise stay f32
            ws.append(w_p)
            bs.append(b_p)
        self.ws = tuple(ws)
        self.bs = tuple(bs)

    def __call__(self, x, return_hid=False):
        assert x.shape[1] == self.layer_list[0]
        return _mlps_forward(
            x, self.ws, self.bs,
            layer_list=self.layer_list, active_last=self.active_last,
            compute_hid=bool(return_hid), use_bf16=self.use_bf16)


def _reference_forward(params, x, active_last, return_hid):
    """Pure-jnp reference for correctness checking."""
    hids = []
    n = len(params)
    inp = x
    out = x
    for i, (w, b) in enumerate(params):
        z = inp @ w.T + b
        out = jnp.maximum(z, 0.0) if (i != n - 1 or active_last) else z
        inp = out
        if return_hid:
            h = jnp.mean(jax.nn.sigmoid(z), axis=0)
            hids.append(h.reshape(-1, 1))
            hids.append(h)
    return hids, out


if __name__ == "__main__":
    key = jax.random.PRNGKey(0)
    k_x, k_p = jax.random.split(key)

    batch = 8
    layer_list = [16, 32, 32, 8]          # MLPS([16, 32, 32, 8])
    x = jax.random.normal(k_x, (batch, layer_list[0]), jnp.float32)

    model = MLPSPallas(layer_list, k_p, active_last=False)

    # return_hid=True path (fused kernel variant with hid output)
    hids, out_x = model(x, return_hid=True)
    out_x = jax.block_until_ready(out_x)
    hids = [jax.block_until_ready(h) for h in hids]

    ref_hids, ref_out = _reference_forward(model.params, x, False, True)
    assert out_x.shape == (batch, layer_list[-1])
    assert jnp.allclose(out_x, ref_out, atol=1e-5, rtol=1e-5)
    assert len(hids) == 2 * model.n_layer
    for h, rh in zip(hids, ref_hids):
        assert h.shape == rh.shape
        assert jnp.allclose(h, rh, atol=1e-5, rtol=1e-5)

    # return_hid=False path (kernel variant without the hid output / EUP work)
    hids2, out2 = model(x, return_hid=False)
    jax.block_until_ready(out2)
    assert list(hids2) == []
    assert jnp.allclose(out2, ref_out, atol=1e-5, rtol=1e-5)

    # Different (non-multiple-of-8) batch reuses the same padded-shape kernel;
    # b_real arrives as SMEM data so the sigmoid-mean mask is exact.
    x5 = jax.random.normal(jax.random.PRNGKey(3), (5, layer_list[0]), jnp.float32)
    hids5, out5 = model(x5, return_hid=True)
    jax.block_until_ready(out5)
    ref_hids5, ref_out5 = _reference_forward(model.params, x5, False, True)
    assert jnp.allclose(out5, ref_out5, atol=1e-5, rtol=1e-5)
    for h, rh in zip(hids5, ref_hids5):
        assert jnp.allclose(h, rh, atol=1e-5, rtol=1e-5)

    # Optional bf16-matmul variant (f32 accumulate + f32 elementwise) — the
    # MXU-native path for v6e/v7x once widths grow; looser tolerance here.
    model_bf16 = MLPSPallas(layer_list, k_p, active_last=False,
                            use_bf16_matmul=True)
    hids_b, out_b = model_bf16(x, return_hid=True)
    jax.block_until_ready(out_b)
    ref_hids_b, ref_out_b = _reference_forward(model_bf16.params, x, False, True)
    assert jnp.allclose(out_b, ref_out_b, atol=5e-2, rtol=5e-2)
    for h, rh in zip(hids_b, ref_hids_b):
        assert jnp.allclose(h, rh, atol=5e-2, rtol=5e-2)

    print("KERNEL_OK")
</pallas_src>

<mosaic_0001>
module attributes {stable_mosaic.version = 11 : i64} {
  func.func @_mlps_fused_kernel(%arg0: memref<1xi32, #tpu.memory_space<smem>>, %arg1: memref<8x128xf32, #tpu.memory_space<vmem>>, %arg2: memref<128x128xf32, #tpu.memory_space<vmem>>, %arg3: memref<128x128xf32, #tpu.memory_space<vmem>>, %arg4: memref<128x128xf32, #tpu.memory_space<vmem>>, %arg5: memref<1x128xf32, #tpu.memory_space<vmem>>, %arg6: memref<1x128xf32, #tpu.memory_space<vmem>>, %arg7: memref<1x128xf32, #tpu.memory_space<vmem>>, %arg8: memref<8x128xf32, #tpu.memory_space<vmem>>, %arg9: memref<3x128xf32, #tpu.memory_space<vmem>>) attributes {dimension_semantics = [], scalar_prefetch = 0 : i64, scratch_operands = 0 : i64, tpu.core_type = #tpu.core_type<tc>} {
    %c0 = arith.constant 0 : index
    %c0_0 = arith.constant 0 : index
    %0 = vector.load %arg1[%c0, %c0_0] : memref<8x128xf32, #tpu.memory_space<vmem>>, vector<8x128xf32>
    %c0_1 = arith.constant 0 : index
    %1 = memref.load %arg0[%c0_1] : memref<1xi32, #tpu.memory_space<smem>>
    %2 = arith.sitofp %1 : i32 to f32
    %cst = arith.constant 1.000000e+00 : f32
    %3 = arith.divf %cst, %2 : f32
    %4 = tpu.iota {dimensions = array<i32: 0>} : vector<8x1xi32>
    %5 = vector.broadcast %1 : i32 to vector<8x1xi32>
    %6 = arith.cmpi slt, %4, %5 : vector<8x1xi32>
    %cst_2 = arith.constant 0.000000e+00 : f32
    %7 = vector.broadcast %3 : f32 to vector<8x1xf32>
    %8 = vector.broadcast %cst_2 : f32 to vector<8x1xf32>
    %9 = arith.select %6, %7, %8 : vector<8x1xi1>, vector<8x1xf32>
    %c0_3 = arith.constant 0 : index
    %c0_4 = arith.constant 0 : index
    %10 = vector.load %arg2[%c0_3, %c0_4] : memref<128x128xf32, #tpu.memory_space<vmem>>, vector<128x128xf32>
    %cst_5 = arith.constant dense<0.000000e+00> : vector<8x128xf32>
    %11 = tpu.matmul %0, %10, %cst_5 {dimension_numbers = #tpu.dot_dimension_numbers<[1], [0], [0], [1], [0, 0, 1, 1], [], []>} : vector<8x128xf32>, vector<128x128xf32>, vector<8x128xf32> -> vector<8x128xf32>
    %c0_6 = arith.constant 0 : index
    %c0_7 = arith.constant 0 : index
    %12 = vector.load %arg5[%c0_6, %c0_7] : memref<1x128xf32, #tpu.memory_space<vmem>>, vector<1x128xf32>
    %13 = vector.broadcast %12 : vector<1x128xf32> to vector<8x128xf32>
    %14 = arith.addf %11, %13 : vector<8x128xf32>
    %cst_8 = arith.constant 0.000000e+00 : f32
    %15 = vector.broadcast %cst_8 : f32 to vector<8x128xf32>
    %16 = arith.maximumf %14, %15 : vector<8x128xf32>
    %17 = arith.negf %14 : vector<8x128xf32>
    %18 = math.exp %17 : vector<8x128xf32>
    %cst_9 = arith.constant 1.000000e+00 : f32
    %19 = vector.broadcast %cst_9 : f32 to vector<8x128xf32>
    %20 = arith.addf %19, %18 : vector<8x128xf32>
    %21 = arith.divf %19, %20 : vector<8x128xf32>
    %22 = vector.broadcast %9 : vector<8x1xf32> to vector<8x128xf32>
    %23 = arith.mulf %21, %22 : vector<8x128xf32>
    %cst_10 = arith.constant dense<0.000000e+00> : vector<128xf32>
    %24 = vector.multi_reduction <add>, %23, %cst_10 [0] : vector<8x128xf32> to vector<128xf32>
    %25 = vector.shape_cast %24 : vector<128xf32> to vector<1x128xf32>
    %c0_11 = arith.constant 0 : index
    %c0_12 = arith.constant 0 : index
    %26 = vector.load %arg9[%c0_11, %c0_12] : memref<3x128xf32, #tpu.memory_space<vmem>>, vector<1x128xf32>
    tpu.vector_store %arg9[%c0_11, %c0_12], %25 {strides = array<i32>} : memref<3x128xf32, #tpu.memory_space<vmem>>, vector<1x128xf32>,
    %c0_13 = arith.constant 0 : index
    %c0_14 = arith.constant 0 : index
    %27 = vector.load %arg3[%c0_13, %c0_14] : memref<128x128xf32, #tpu.memory_space<vmem>>, vector<128x128xf32>
    %cst_15 = arith.constant dense<0.000000e+00> : vector<8x128xf32>
    %28 = tpu.matmul %16, %27, %cst_15 {dimension_numbers = #tpu.dot_dimension_numbers<[1], [0], [0], [1], [0, 0, 1, 1], [], []>} : vector<8x128xf32>, vector<128x128xf32>, vector<8x128xf32> -> vector<8x128xf32>
    %c0_16 = arith.constant 0 : index
    %c0_17 = arith.constant 0 : index
    %29 = vector.load %arg6[%c0_16, %c0_17] : memref<1x128xf32, #tpu.memory_space<vmem>>, vector<1x128xf32>
    %30 = vector.broadcast %29 : vector<1x128xf32> to vector<8x128xf32>
    %31 = arith.addf %28, %30 : vector<8x128xf32>
    %cst_18 = arith.constant 0.000000e+00 : f32
    %32 = vector.broadcast %cst_18 : f32 to vector<8x128xf32>
    %33 = arith.maximumf %31, %32 : vector<8x128xf32>
    %34 = arith.negf %31 : vector<8x128xf32>
    %35 = math.exp %34 : vector<8x128xf32>
    %cst_19 = arith.constant 1.000000e+00 : f32
    %36 = vector.broadcast %cst_19 : f32 to vector<8x128xf32>
    %37 = arith.addf %36, %35 : vector<8x128xf32>
    %38 = arith.divf %36, %37 : vector<8x128xf32>
    %39 = vector.broadcast %9 : vector<8x1xf32> to vector<8x128xf32>
    %40 = arith.mulf %38, %39 : vector<8x128xf32>
    %cst_20 = arith.constant dense<0.000000e+00> : vector<128xf32>
    %41 = vector.multi_reduction <add>, %40, %cst_20 [0] : vector<8x128xf32> to vector<128xf32>
    %42 = vector.shape_cast %41 : vector<128xf32> to vector<1x128xf32>
    %c1 = arith.constant 1 : index
    %c0_21 = arith.constant 0 : index
    %43 = vector.load %arg9[%c1, %c0_21] : memref<3x128xf32, #tpu.memory_space<vmem>>, vector<1x128xf32>
    tpu.vector_store %arg9[%c1, %c0_21], %42 {strides = array<i32>} : memref<3x128xf32, #tpu.memory_space<vmem>>, vector<1x128xf32>,
    %c0_22 = arith.constant 0 : index
    %c0_23 = arith.constant 0 : index
    %44 = vector.load %arg4[%c0_22, %c0_23] : memref<128x128xf32, #tpu.memory_space<vmem>>, vector<128x128xf32>
    %cst_24 = arith.constant dense<0.000000e+00> : vector<8x128xf32>
    %45 = tpu.matmul %33, %44, %cst_24 {dimension_numbers = #tpu.dot_dimension_numbers<[1], [0], [0], [1], [0, 0, 1, 1], [], []>} : vector<8x128xf32>, vector<128x128xf32>, vector<8x128xf32> -> vector<8x128xf32>
    %c0_25 = arith.constant 0 : index
    %c0_26 = arith.constant 0 : index
    %46 = vector.load %arg7[%c0_25, %c0_26] : memref<1x128xf32, #tpu.memory_space<vmem>>, vector<1x128xf32>
    %47 = vector.broadcast %46 : vector<1x128xf32> to vector<8x128xf32>
    %48 = arith.addf %45, %47 : vector<8x128xf32>
    %49 = arith.negf %48 : vector<8x128xf32>
    %50 = math.exp %49 : vector<8x128xf32>
    %cst_27 = arith.constant 1.000000e+00 : f32
    %51 = vector.broadcast %cst_27 : f32 to vector<8x128xf32>
    %52 = arith.addf %51, %50 : vector<8x128xf32>
    %53 = arith.divf %51, %52 : vector<8x128xf32>
    %54 = vector.broadcast %9 : vector<8x1xf32> to vector<8x128xf32>
    %55 = arith.mulf %53, %54 : vector<8x128xf32>
    %cst_28 = arith.constant dense<0.000000e+00> : vector<128xf32>
    %56 = vector.multi_reduction <add>, %55, %cst_28 [0] : vector<8x128xf32> to vector<128xf32>
    %57 = vector.shape_cast %56 : vector<128xf32> to vector<1x128xf32>
    %c2 = arith.constant 2 : index
    %c0_29 = arith.constant 0 : index
    %58 = vector.load %arg9[%c2, %c0_29] : memref<3x128xf32, #tpu.memory_space<vmem>>, vector<1x128xf32>
    tpu.vector_store %arg9[%c2, %c0_29], %57 {strides = array<i32>} : memref<3x128xf32, #tpu.memory_space<vmem>>, vector<1x128xf32>,
    %c0_30 = arith.constant 0 : index
    %c0_31 = arith.constant 0 : index
    %59 = vector.load %arg8[%c0_30, %c0_31] : memref<8x128xf32, #tpu.memory_space<vmem>>, vector<8x128xf32>
    tpu.vector_store %arg8[%c0_30, %c0_31], %48 {strides = array<i32>} : memref<8x128xf32, #tpu.memory_space<vmem>>, vector<8x128xf32>,
    return
  }
}

</mosaic_0001>

<bundles_post_ra>
// kernel: _mlps_forward.1
= control target key start
LH: loop header
LB: loop body
LE: loop exit
PB: predicated region body
PF: predicated region fallthrough
CT: control target
= control target key end

     0   :  { %16 = vsyncpa [#allocation4], 0  ;;  %s963_s0 = inlined_call_operand.<no memory space> [shape: s32[1], index: 0, kind: input, shape index: {}]   ;;  %s964_s1 = inlined_call_operand.vmem [shape: f32[8,128], index: 1, kind: input, shape index: {}]   ;;  %s965_s2 = inlined_call_operand.hbm [shape: f32[128,128], index: 2, kind: input, shape index: {}]   ;;  %s966_s3 = inlined_call_operand.hbm [shape: f32[128,128], index: 3, kind: input, shape index: {}]   ;;  %s967_s4 = inlined_call_operand.hbm [shape: f32[128,128], index: 4, kind: input, shape index: {}]   ;;  %s968_s5 = inlined_call_operand.vmem [shape: f32[1,128], index: 5, kind: input, shape index: {}]   ;;  %s969_s6 = inlined_call_operand.vmem [shape: f32[1,128], index: 6, kind: input, shape index: {}]   ;;  %s970_s7 = inlined_call_operand.vmem [shape: f32[1,128], index: 7, kind: input, shape index: {}]   ;;  %s971_s8 = inlined_call_operand.hbm [shape: f32[8,128], index: 8, kind: output, shape index: {0}]   ;;  %s972_s9 = inlined_call_operand.vmem [shape: f32[3,128], index: 9, kind: output, shape index: {1}]  }
   0x1   :  { %17 = vsyncpa [#allocation7], 0 }
   0x2   :  { %18 = vsyncpa [#allocation5], 0  ;;  %s783_s30 = smov [#allocation6]   ;;  %s784_s11 = smov [#allocation3]  }
   0x3   :  { %s40_s10 = sshll.u32 %s783_s30, 4  ;;  %s28_s12 = sshll.u32 %s784_s11, 4  ;;  %s41_s10 = int_to_ptr.vmem [resolvable:$true] %s40_s10  ;;  %s842_s12 = int_to_ptr.vmem [resolvable:$true] %s28_s12 }
   0x4   :  { %s689_s15 = scalar_lea.hbm %s966_s3, 2048 }
   0x5   :  { %p690_p0 = scmp.ne.s32.totalorder %s966_s3, %s689_s15  ;;  %p693_p1 = scmp.lt.u32.totalorder %s689_s15, %s966_s3 }
   0x7   :  { %p695_p2 = pnand %p693_p1, %p690_p0 }
   0x9   :  { %698 = shalt.err (!%p695_p2)
}
   0xa   :  { %s699_s20 = scalar_lea.vmem %s41_s10, 2048  ;;  %p704_p4 = scmp.lt.s32.totalorder %s41_s10, %s41_s10 }
   0xb   :  { %p700_p3 = scmp.ne.s32.totalorder %s41_s10, %s699_s20  ;;  %p705_p5 = scmp.lt.s32.totalorder %s699_s20, %s699_s20 }
   0xd   :  { %p706_p6 = por %p705_p5, %p704_p4 }
   0xf   :  { %p707_p7 = pnand %p706_p6, %p700_p3 }
  0x11   :  { %710 = shalt.err (!%p707_p7)
}
  0x12   :  { %s785_s21 = smov 128   ;;  %s786_s22 = smov 8  }
  0x13   :  { %46 = dma.hbm_to_vmem [thread:$0]  %s966_s3, 2048, %s41_s10, [#allocation7], %s785_s21, %s785_s21, %s786_s22  }
  0x14   :  { %s711_s27 = scalar_lea.hbm %s965_s2, 2048 }
  0x15   :  { %p712_p8 = scmp.ne.s32.totalorder %s965_s2, %s711_s27  ;;  %p715_p9 = scmp.lt.u32.totalorder %s711_s27, %s965_s2 }
  0x17   :  { %p717_p10 = pnand %p715_p9, %p712_p8 }
  0x19   :  { %720 = shalt.err (!%p717_p10)
}
  0x1a   :  { %s721_s13 = scalar_lea.vmem %s842_s12, 2048  ;;  %p726_p12 = scmp.lt.s32.totalorder %s842_s12, %s842_s12 }
  0x1b   :  { %p722_p11 = scmp.ne.s32.totalorder %s842_s12, %s721_s13  ;;  %p727_p13 = scmp.lt.s32.totalorder %s721_s13, %s721_s13 }
  0x1d   :  { %p728_p0 = por %p727_p13, %p726_p12 }
  0x1f   :  { %p729_p1 = pnand %p728_p0, %p722_p11 }
  0x21   :  { %732 = shalt.err (!%p729_p1)
}
  0x22   :  { %34 = dma.hbm_to_vmem [thread:$0]  %s965_s2, 2048, %s842_s12, [#allocation4], %s785_s21, %s785_s21, %s786_s22  }
  0x23   :  { %s787_s14 = smov [#allocation8]   ;;  %s733_s18 = scalar_lea.hbm %s967_s4, 2048 }
  0x24   :  { %s52_s15 = sshll.u32 %s787_s14, 4  ;;  %p734_p2 = scmp.ne.s32.totalorder %s967_s4, %s733_s18  ;;  %s53_s15 = int_to_ptr.vmem [resolvable:$true] %s52_s15 }
  0x25   :  { %p737_p3 = scmp.lt.u32.totalorder %s733_s18, %s967_s4 }
  0x27   :  { %p739_p4 = pnand %p737_p3, %p734_p2 }
  0x29   :  { %742 = shalt.err (!%p739_p4)
}
  0x2a   :  { %s743_s25 = scalar_lea.vmem %s53_s15, 2048  ;;  %p748_p6 = scmp.lt.s32.totalorder %s53_s15, %s53_s15 }
  0x2b   :  { %p744_p5 = scmp.ne.s32.totalorder %s53_s15, %s743_s25  ;;  %p749_p7 = scmp.lt.s32.totalorder %s743_s25, %s743_s25 }
  0x2d   :  { %p750_p8 = por %p749_p7, %p748_p6 }
  0x2f   :  { %p751_p9 = pnand %p750_p8, %p744_p5 }
  0x31   :  { %754 = shalt.err (!%p751_p9)
}
  0x32   :  { %58 = dma.hbm_to_vmem [thread:$0]  %s967_s4, 2048, %s53_s15, [#allocation7], %s785_s21, %s785_s21, %s786_s22  }
  0x33   :  { %777 = dma.done.wait [#allocation4], 2048  }
  0x34   :  { %778 = vsyncadd [#allocation4], 4294965248 }
  0x35   :  { %779 = dma.done.wait [#allocation7], 4096  }
  0x36   :  { %780 = vsyncadd [#allocation7], 4294963200  ;;  %s76_s28 = scvt.s32.f32 %s963_s0  ;;  %v788_v0 = vmov 0.0|0.0   ;;  %vm789_vm0 = vmmov 0   ;;  %v790_v1 = vmov 0.0   ;;  %v86_v3 = vld [vmem:[#allocation3] sm:$0xff] }
  0x37   :  { %592 = vmatprep.subr.bf16.mxu0 %v788_v0  ;;  %519 = vmatprep.mubr.msk.f32.mxu0 %vm789_vm0, %v790_v1  ;;  %v87_v4 = vld [vmem:[#allocation3 + $0x8] sm:$0xff]  ;;  %v88_v5 = vld [vmem:[#allocation3 + $0x10] sm:$0xff]  ;;  %v89_v7 = vld [vmem:[#allocation3 + $0x18] sm:$0xff]  ;;  %s791_s16 = smov [#allocation9]  }
  0x38   :  { %616 = vmatprep.subr.bf16.mxu1 %v788_v0  ;;  %v77_v2 = vstv %s76_s28  ;;  %554 = vmatprep.mubr.msk.f32.mxu1 %vm789_vm0, %v790_v1  ;;  %v593_v6 = vpack.c.bf16 %v87_v4, %v86_v3  ;;  %v596_v8 = vpack.c.bf16 %v89_v7, %v88_v5  ;;  %v90_v9 = vld [vmem:[#allocation3 + $0x20] sm:$0xff]  ;;  %v91_v10 = vld [vmem:[#allocation3 + $0x28] sm:$0xff]  ;;  %v196_v14 = vld [vmem:[#allocation6 + $0x10] sm:$0xff]  ;;  %s416_s17 = sshll.u32 %s791_s16, 4  ;;  %s417_s17 = int_to_ptr.vmem [resolvable:$true] %s416_s17 }
  0x39   :  { %675 = vrcp.f32 %v77_v2  ;;  %v194_v11 = vld [vmem:[#allocation6] sm:$0xff]  ;;  %v195_v13 = vld [vmem:[#allocation6 + $0x8] sm:$0xff]  ;;  %v197_v15 = vld [vmem:[#allocation6 + $0x18] sm:$0xff]  ;;  %v599_v16 = vpack.c.bf16 %v91_v10, %v90_v9  ;;  %s755_s18 = scalar_lea.vmem %s417_s17, 128  ;;  %p760_p11 = scmp.lt.s32.totalorder %s417_s17, %s417_s17 }
  0x3a   :  { %594 = vmatpush3.bf16.msra.mxu0 %v593_v6  ;;  %v617_v17 = vpack.c.bf16 %v195_v13, %v194_v11  ;;  %v92_v18 = vld [vmem:[#allocation3 + $0x30] sm:$0xff]  ;;  %v93_v19 = vld [vmem:[#allocation3 + $0x38] sm:$0xff]  ;;  %v620_v20 = vpack.c.bf16 %v197_v15, %v196_v14  ;;  %v198_v21 = vld [vmem:[#allocation6 + $0x20] sm:$0xff]  ;;  %p756_p10 = scmp.ne.s32.totalorder %s417_s17, %s755_s18  ;;  %p761_p12 = scmp.lt.s32.totalorder %s755_s18, %s755_s18 }
  0x3b   :  { %595 = vmatprep.subr.bf16.mxu0 %v788_v0  ;;  %v199_v22 = vld [vmem:[#allocation6 + $0x28] sm:$0xff]  ;;  %v602_v23 = vpack.c.bf16 %v93_v19, %v92_v18  ;;  %v94_v24 = vld [vmem:[#allocation3 + $0x40] sm:$0xff]  ;;  %v200_v27 = vld [vmem:[#allocation6 + $0x30] sm:$0xff]  ;;  %v80_v18 = vlaneseq }
  0x3c   :  { %618 = vmatpush3.bf16.msra.mxu1 %v617_v17  ;;  %v95_v25 = vld [vmem:[#allocation3 + $0x48] sm:$0xff]  ;;  %v623_v26 = vpack.c.bf16 %v199_v22, %v198_v21  ;;  %v201_v28 = vld [vmem:[#allocation6 + $0x38] sm:$0xff]  ;;  %v96_v30 = vld [vmem:[#allocation3 + $0x50] sm:$0xff]  ;;  %p762_p13 = por %p761_p12, %p760_p11 }
  0x3d   :  { %619 = vmatprep.subr.bf16.mxu1 %v788_v0  ;;  %v605_v29 = vpack.c.bf16 %v95_v25, %v94_v24  ;;  %v97_v31 = vld [vmem:[#allocation3 + $0x58] sm:$0xff]  ;;  %v626_v32 = vpack.c.bf16 %v201_v28, %v200_v27  ;;  %v202_v33 = vld [vmem:[#allocation6 + $0x40] sm:$0xff]  ;;  %v203_v34 = vld [vmem:[#allocation6 + $0x48] sm:$0xff] }
  0x3e   :  { %597 = vmatpush3.bf16.msra.mxu0 %v596_v8  ;;  %v608_v35 = vpack.c.bf16 %v97_v31, %v96_v30  ;;  %v98_v36 = vld [vmem:[#allocation3 + $0x60] sm:$0xff]  ;;  %v99_v37 = vld [vmem:[#allocation3 + $0x68] sm:$0xff]  ;;  %v629_v38 = vpack.c.bf16 %v203_v34, %v202_v33  ;;  %v204_v39 = vld [vmem:[#allocation6 + $0x50] sm:$0xff]  ;;  %p763_p0 = pnand %p762_p13, %p756_p10 }
  0x3f   :  { %598 = vmatprep.subr.bf16.mxu0 %v788_v0  ;;  %v205_v40 = vld [vmem:[#allocation6 + $0x58] sm:$0xff]  ;;  %v611_v41 = vpack.c.bf16 %v99_v37, %v98_v36  ;;  %v100_v42 = vld [vmem:[#allocation3 + $0x70] sm:$0xff]  ;;  %v206_v45 = vld [vmem:[#allocation6 + $0x60] sm:$0xff] }
  0x40   :  { %621 = vmatpush3.bf16.msra.mxu1 %v620_v20  ;;  %v101_v43 = vld [vmem:[#allocation3 + $0x78] sm:$0xff]  ;;  %v632_v44 = vpack.c.bf16 %v205_v40, %v204_v39  ;;  %v207_v46 = vld [vmem:[#allocation6 + $0x68] sm:$0xff]  ;;  %v74_v49 = vld [vmem:[%s964_s1] sm:$0xff]  ;;  %v81_v20 = vshrl.u32 %v80_v18, 7 }
  0x41   :  { %622 = vmatprep.subr.bf16.mxu1 %v788_v0  ;;  %v614_v47 = vpack.c.bf16 %v101_v43, %v100_v42  ;;  %v635_v48 = vpack.c.bf16 %v207_v46, %v206_v45  ;;  %v208_v50 = vld [vmem:[#allocation6 + $0x70] sm:$0xff]  ;;  %v209_v51 = vld [vmem:[#allocation6 + $0x78] sm:$0xff]  ;;  %v302_v53 = vld [vmem:[#allocation8] sm:$0xff] }
  0x42   :  { %600 = vmatpush3.bf16.msra.mxu0 %v599_v16  ;;  %v638_v52 = vpack.c.bf16 %v209_v51, %v208_v50  ;;  %v303_v54 = vld [vmem:[#allocation8 + $0x8] sm:$0xff]  ;;  %v304_v55 = vld [vmem:[#allocation8 + $0x10] sm:$0xff]  ;;  %v305_v57 = vld [vmem:[#allocation8 + $0x18] sm:$0xff] }
  0x43   :  { %v676_v12 = vpop.eup %675  ;;  %601 = vmatprep.subr.bf16.mxu0 %v788_v0  ;;  %v641_v56 = vpack.c.bf16 %v303_v54, %v302_v53  ;;  %v644_v58 = vpack.c.bf16 %v305_v57, %v304_v55  ;;  %v306_v59 = vld [vmem:[#allocation8 + $0x20] sm:$0xff]  ;;  %v307_v60 = vld [vmem:[#allocation8 + $0x28] sm:$0xff]  ;;  %v308_v62 = vld [vmem:[#allocation8 + $0x30] sm:$0xff] }
  0x44   :  { %664 = vpush %v676_v12  ;;  %624 = vmatpush3.bf16.msra.mxu1 %v623_v26  ;;  %v647_v61 = vpack.c.bf16 %v307_v60, %v306_v59  ;;  %v309_v63 = vld [vmem:[#allocation8 + $0x38] sm:$0xff]  ;;  %v310_v2 = vld [vmem:[#allocation8 + $0x40] sm:$0xff]  ;;  %v311_v3 = vld [vmem:[#allocation8 + $0x48] sm:$0xff] }
  0x45   :  { %625 = vmatprep.subr.bf16.mxu1 %v788_v0  ;;  %v653_v4 = vpack.c.bf16 %v311_v3, %v310_v2  ;;  %v312_v5 = vld [vmem:[#allocation8 + $0x50] sm:$0xff]  ;;  %v313_v6 = vld [vmem:[#allocation8 + $0x58] sm:$0xff]  ;;  %v314_v8 = vld [vmem:[#allocation8 + $0x60] sm:$0xff] }
  0x46   :  { %603 = vmatpush3.bf16.msra.mxu0 %v602_v23  ;;  %v656_v7 = vpack.c.bf16 %v313_v6, %v312_v5  ;;  %v315_v9 = vld [vmem:[#allocation8 + $0x68] sm:$0xff]  ;;  %v430_v11 = vld [vmem:[%s968_s5] ss:$0 sm:$0xff]  ;;  %v316_v31 = vld [vmem:[#allocation8 + $0x70] sm:$0xff] }
  0x47   :  { %604 = vmatprep.subr.bf16.mxu0 %v788_v0  ;;  %v659_v10 = vpack.c.bf16 %v315_v9, %v314_v8  ;;  %v432_v34 = vld [vmem:[%s969_s6] ss:$0 sm:$0xff] }
  0x48   :  { %627 = vmatpush3.bf16.msra.mxu1 %v626_v32  ;;  %v317_v32 = vld [vmem:[#allocation8 + $0x78] sm:$0xff]  ;;  %v434_v50 = vld [vmem:[%s970_s7] ss:$0 sm:$0xff] }
  0x49   :  { %628 = vmatprep.subr.bf16.mxu1 %v788_v0  ;;  %v662_v33 = vpack.c.bf16 %v317_v32, %v316_v31 }
  0x4a   :  { %606 = vmatpush3.bf16.msra.mxu0 %v605_v29 }
  0x4b   :  { %607 = vmatprep.subr.bf16.mxu0 %v788_v0 }
  0x4c   :  { %630 = vmatpush3.bf16.msra.mxu1 %v629_v38 }
  0x4d   :  { %631 = vmatprep.subr.bf16.mxu1 %v788_v0 }
  0x4e   :  { %609 = vmatpush3.bf16.msra.mxu0 %v608_v35 }
  0x4f   :  { %610 = vmatprep.subr.bf16.mxu0 %v788_v0 }
  0x50   :  { %633 = vmatpush3.bf16.msra.mxu1 %v632_v44 }
  0x51   :  { %634 = vmatprep.subr.bf16.mxu1 %v788_v0 }
  0x52   :  { %612 = vmatpush3.bf16.msra.mxu0 %v611_v41 }
  0x53   :  { %613 = vmatprep.subr.bf16.mxu0 %v788_v0 }
  0x54   :  { %636 = vmatpush3.bf16.msra.mxu1 %v635_v48 }
  0x55   :  { %637 = vmatprep.subr.bf16.mxu1 %v788_v0 }
  0x56   :  { %615 = vmatpush3.bf16.msra.mxu0 %v614_v47 }
  0x57   :  { %640 = vmatprep.subr.bf16.mxu0 %v788_v0 }
  0x58   :  { %639 = vmatpush3.bf16.msra.mxu1 %v638_v52 }
  0x59   :  { %520 = vmatmul.mubr.f32.vlgmr.msra.gmra.mrb[0].mxu0 %v74_v49 }
  0x5a   :  { %589 = vmatprep.mubr.msk.f32.mxu0 %vm789_vm0, %v790_v1  ;;  %642 = vmatpush3.bf16.msra.mxu0 %v641_v56  ;;  %v650_v1 = vpack.c.bf16 %v309_v63, %v308_v62 }
  0x5b   :  { %643 = vmatprep.subr.bf16.mxu0 %v788_v0 }
  0x5e   :  { %645 = vmatpush3.bf16.msra.mxu0 %v644_v58 }
  0x5f   :  { %646 = vmatprep.subr.bf16.mxu0 %v788_v0 }
  0x62   :  { %648 = vmatpush3.bf16.msra.mxu0 %v647_v61 }
  0x63   :  { %649 = vmatprep.subr.bf16.mxu0 %v788_v0 }
  0x66   :  { %651 = vmatpush3.bf16.msra.mxu0 %v650_v1 }
  0x67   :  { %652 = vmatprep.subr.bf16.mxu0 %v788_v0 }
  0x6a   :  { %654 = vmatpush3.bf16.msra.mxu0 %v653_v4 }
  0x6b   :  { %655 = vmatprep.subr.bf16.mxu0 %v788_v0 }
  0x6e   :  { %657 = vmatpush3.bf16.msra.mxu0 %v656_v7 }
  0x6f   :  { %658 = vmatprep.subr.bf16.mxu0 %v788_v0 }
  0x72   :  { %660 = vmatpush3.bf16.msra.mxu0 %v659_v10 }
  0x73   :  { %661 = vmatprep.subr.bf16.mxu0 %v788_v0  ;;  %v82_v0 = vstv %s963_s0 }
  0x74   :  { %vm83_vm1 = vcmp.lt.s32.totalorder %v81_v20, %v82_v0 }
  0x75   :  { %s665_s29 = spop %664 }
  0x76   :  { %v84_v21 = vstv %s665_s29  ;;  %663 = vmatpush3.bf16.msra.mxu0 %v662_v33 }
  0x77   :  { %v85_v22 = vsel %vm83_vm1, %v84_v21, 0.0 }
 0x12c   :  { %v175_v12 = vpop.f32.mrb[0].mxu0 }
 0x12d   :  { %v176_v13 = vadd.f32 %v430_v11, %v175_v12  ;;  %v521_v14 = vpop.f32.mrb[1].mxu0 }
 0x12f   :  { %v179_v15 = vmax.f32 %v176_v13, 0.0  ;;  %v431_v16 = vmul.f32 -1.442695, %v176_v13 }
 0x131   :  { %677 = vpow2.f32 %v431_v16  ;;  %555 = vmatmul.mubr.f32.vlgmr.msra.gmra.mrb[0].mxu1 %v179_v15 }
 0x13b   :  { %v678_v17 = vpop.eup %677 }
 0x13c   :  { %v183_v19 = vadd.f32 1.0, %v678_v17 }
 0x13e   :  { %679 = vrcp.f32 %v183_v19 }
 0x148   :  { %v680_v23 = vpop.eup %679 }
 0x149   :  { %v186_v24 = vmul.f32 %v680_v23, %v85_v22 }
 0x14b   :  { %v187_v25 = vrot.slane %v186_v24, 4 }
 0x14d   :  { %v188_v26 = vadd.f32 %v187_v25, %v186_v24 }
 0x14f   :  { %v189_v27 = vrot.slane %v188_v26, 2 }
 0x151   :  { %v190_v28 = vadd.f32 %v189_v27, %v188_v26 }
 0x153   :  { %v191_v29 = vrot.slane %v190_v28, 1 }
 0x155   :  { %v192_v30 = vadd.f32 %v191_v29, %v190_v28 }
 0x157   :  { %193 = vst [vmem:[%s972_s9] sm:$0x1] %v192_v30 }
 0x204   :  { %v283_v35 = vpop.f32.mrb[0].mxu1 }
 0x205   :  { %v284_v36 = vadd.f32 %v432_v34, %v283_v35  ;;  %v556_v37 = vpop.f32.mrb[1].mxu1 }
 0x207   :  { %v287_v38 = vmax.f32 %v284_v36, 0.0  ;;  %v433_v39 = vmul.f32 -1.442695, %v284_v36 }
 0x209   :  { %681 = vpow2.f32 %v433_v39  ;;  %590 = vmatmul.mubr.f32.vlgmr.msra.gmra.mrb[2].mxu0 %v287_v38 }
 0x213   :  { %v682_v40 = vpop.eup %681 }
 0x214   :  { %v291_v41 = vadd.f32 1.0, %v682_v40 }
 0x216   :  { %683 = vrcp.f32 %v291_v41 }
 0x220   :  { %v684_v42 = vpop.eup %683 }
 0x221   :  { %v294_v43 = vmul.f32 %v684_v42, %v85_v22 }
 0x223   :  { %v295_v44 = vrot.slane %v294_v43, 4 }
 0x225   :  { %v296_v45 = vadd.f32 %v295_v44, %v294_v43 }
 0x227   :  { %v297_v46 = vrot.slane %v296_v45, 2 }
 0x229   :  { %v298_v47 = vadd.f32 %v297_v46, %v296_v45 }
 0x22b   :  { %v299_v48 = vrot.slane %v298_v47, 1 }
 0x22d   :  { %v300_v49 = vadd.f32 %v299_v48, %v298_v47 }
 0x22f   :  { %301 = vst [vmem:[%s972_s9 + $0x1] sm:$0x1] %v300_v49 }
 0x2dc   :  { %v391_v51 = vpop.f32.mrb[2].mxu0 }
 0x2dd   :  { %v392_v52 = vadd.f32 %v434_v50, %v391_v51  ;;  %v591_v53 = vpop.f32.mrb[3].mxu0 }
 0x2df   :  { %v435_v54 = vmul.f32 -1.442695, %v392_v52  ;;  %409 = vst [vmem:[#allocation9] sm:$0xff] %v392_v52 }
 0x2e0   :  { %766 = shalt.err (!%p763_p0)
}
 0x2e1   :  { %s767_s23 = scalar_lea.hbm %s971_s8, 128 }
 0x2e2   :  { %p768_p1 = scmp.ne.s32.totalorder %s971_s8, %s767_s23  ;;  %p771_p2 = scmp.lt.u32.totalorder %s767_s23, %s971_s8 }
 0x2e4   :  { %p773_p3 = pnand %p771_p2, %p768_p1 }
 0x2e6   :  { %776 = shalt.err (!%p773_p3)
}
 0x2e7   :  { %419 = dma.vmem_to_hbm [thread:$0]  %s417_s17, 128, %s971_s8, [#allocation5]   ;;  %685 = vpow2.f32 %v435_v54 }
 0x2f1   :  { %v686_v55 = vpop.eup %685 }
 0x2f2   :  { %v398_v56 = vadd.f32 1.0, %v686_v55 }
 0x2f4   :  { %687 = vrcp.f32 %v398_v56 }
 0x2fe   :  { %v688_v57 = vpop.eup %687 }
 0x2ff   :  { %v401_v58 = vmul.f32 %v688_v57, %v85_v22 }
 0x301   :  { %v402_v59 = vrot.slane %v401_v58, 4 }
 0x303   :  { %v403_v60 = vadd.f32 %v402_v59, %v401_v58 }
 0x305   :  { %v404_v61 = vrot.slane %v403_v60, 2 }
 0x307   :  { %v405_v62 = vadd.f32 %v404_v61, %v403_v60 }
 0x309   :  { %v406_v63 = vrot.slane %v405_v62, 1 }
 0x30b   :  { %v407_v1 = vadd.f32 %v406_v63, %v405_v62 }
 0x30d   :  { %408 = vst [vmem:[%s972_s9 + $0x2] sm:$0x1] %v407_v1 }
 0x30e   :  { %781 = dma.done.wait [#allocation5], 128  }
 0x30f   :  { %782 = vsyncadd [#allocation5], 4294967168 }
 0x310   :  { %427 = vsyncpa [#allocation4], 1 }
 0x311   :  { %428 = vsyncpa [#allocation7], 1 }
 0x312   :  { %429 = vsyncpa [#allocation5], 1 }

</bundles_post_ra>
